<compile_context>
chip_gen: v5e
topology: v5e:2x2
jax: 0.10.0
libtpu: 0.0.40
codegen_flags: <defaults>
</compile_context>

<pallas_src>
import jax
import jax.numpy as jnp
from jax.experimental import pallas as pl
from jax.experimental.pallas import tpu as pltpu

K_IN, H, OUT = 3099, 10, 2    # logical (PyTorch) dims
H_PAD = 128                    # hidden padded to one lane group (zeros)
TILE_B_MAX = 1024              # f32 x block ~12 MiB -> fits v5e/v6e/v7x VMEM


def _round_up(x, m):
    return (x + m - 1) // m * m


def _sarcasm_kernel(x_ref, w1_ref, b1_ref, w2_ref, b2_ref, o_ref):
    # x_ref: (tile_b, 3099) f32, w1_ref: (3099, 128) bf16 (zero-padded cols).
    x_bf = x_ref[...].astype(jnp.bfloat16)                       # in-kernel cast
    h = jnp.dot(x_bf, w1_ref[...], preferred_element_type=jnp.float32)
    h = jnp.maximum(h + b1_ref[...], 0.0)                        # bias + ReLU, f32
    out = jnp.dot(h.astype(jnp.bfloat16), w2_ref[...],
                  preferred_element_type=jnp.float32) + b2_ref[...]
    o_ref[...] = out.astype(o_ref.dtype)                         # (tile_b, 2)


def prepare_params(w1, b1, w2, b2):
    """Pad / cast parameters once (outside the hot path).

    Expects (in, out) layout: w1 (3099, 10), b1 (10,), w2 (10, 2), b2 (2,).
    Hidden dim padded 10 -> 128 with zeros so results are unchanged.
    """
    w1p = jnp.zeros((K_IN, H_PAD), jnp.bfloat16).at[:, :H].set(
        w1.astype(jnp.bfloat16))
    b1p = jnp.zeros((1, H_PAD), jnp.float32).at[0, :H].set(b1)
    w2p = jnp.zeros((H_PAD, OUT), jnp.bfloat16).at[:H, :].set(
        w2.astype(jnp.bfloat16))
    b2p = b2.astype(jnp.float32).reshape(1, OUT)
    return w1p, b1p, w2p, b2p


def sarcasm_forward(x, params):
    """x: (B, 3099) f32 -> (B, 2) f32, same math as the PyTorch module."""
    w1p, b1p, w2p, b2p = params
    B = x.shape[0]
    tile_b = min(TILE_B_MAX, _round_up(B, 8))
    grid = (pl.cdiv(B, tile_b),)          # last tile partial/masked, no batch pad

    cost = pl.CostEstimate(
        flops=2 * B * K_IN * H_PAD + 2 * B * H_PAD * OUT,
        transcendentals=0,
        bytes_accessed=(B * K_IN * 4          # x (f32, read once)
                        + K_IN * H_PAD * 2    # w1 (bf16)
                        + H_PAD * 4           # b1
                        + H_PAD * OUT * 2     # w2 (bf16)
                        + OUT * 4             # b2
                        + B * OUT * 4),       # out (narrow, f32)
    )

    out = pl.pallas_call(
        _sarcasm_kernel,
        out_shape=jax.ShapeDtypeStruct((B, OUT), jnp.float32),
        grid=grid,
        in_specs=[
            pl.BlockSpec((tile_b, K_IN), lambda i: (i, 0)),   # x streamed per tile
            pl.BlockSpec((K_IN, H_PAD), lambda i: (0, 0)),    # weights resident
            pl.BlockSpec((1, H_PAD), lambda i: (0, 0)),
            pl.BlockSpec((H_PAD, OUT), lambda i: (0, 0)),
            pl.BlockSpec((1, OUT), lambda i: (0, 0)),
        ],
        out_specs=pl.BlockSpec((tile_b, OUT), lambda i: (i, 0)),
        compiler_params=pltpu.CompilerParams(
            dimension_semantics=("parallel",),       # shard batch across TCs (v7x)
            vmem_limit_bytes=56 * 1024 * 1024,       # headroom under v7x's 64 MiB
        ),
        cost_estimate=cost,
    )(x, w1p, b1p, w2p, b2p)

    return out


def init_params(key):
    # Deterministic synthetic init (PyTorch-Linear-style uniform bounds),
    # already in (in_features, out_features) layout.
    k1, k2, k3, k4 = jax.random.split(key, 4)
    bound1 = 1.0 / jnp.sqrt(K_IN)
    bound2 = 1.0 / jnp.sqrt(H)
    w1 = jax.random.uniform(k1, (K_IN, H), jnp.float32, -bound1, bound1)
    b1 = jax.random.uniform(k2, (H,), jnp.float32, -bound1, bound1)
    w2 = jax.random.uniform(k3, (H, OUT), jnp.float32, -bound2, bound2)
    b2 = jax.random.uniform(k4, (OUT,), jnp.float32, -bound2, bound2)
    return w1, b1, w2, b2


if __name__ == "__main__":
    key = jax.random.PRNGKey(0)
    kx, kp = jax.random.split(key)
    B = 8
    x = jax.random.normal(kx, (B, K_IN), dtype=jnp.float32)
    w1, b1, w2, b2 = init_params(kp)
    params = prepare_params(w1, b1, w2, b2)

    out = jax.block_until_ready(sarcasm_forward(x, params))

    # Reference in plain JAX mirroring the kernel's precision choices
    # (bf16 inputs to each matmul, f32 accumulation).
    xb = x.astype(jnp.bfloat16).astype(jnp.float32)
    w1b = w1.astype(jnp.bfloat16).astype(jnp.float32)
    h_ref = jnp.maximum(
        jnp.dot(xb, w1b, precision=jax.lax.Precision.HIGHEST) + b1, 0.0)
    hb = h_ref.astype(jnp.bfloat16).astype(jnp.float32)
    w2b = w2.astype(jnp.bfloat16).astype(jnp.float32)
    ref = jnp.dot(hb, w2b, precision=jax.lax.Precision.HIGHEST) + b2

    assert out.shape == (B, OUT)
    assert jnp.allclose(out, ref, atol=2e-2, rtol=2e-2), float(
        jnp.max(jnp.abs(out - ref)))
    print("KERNEL_OK")
</pallas_src>

<mosaic_0001>
module attributes {stable_mosaic.version = 11 : i64} {
  func.func @_sarcasm_kernel(%arg0: i32, %arg1: memref<8x3099xf32, #tpu.memory_space<vmem>>, %arg2: memref<3099x128xbf16, #tpu.memory_space<vmem>>, %arg3: memref<1x128xf32, #tpu.memory_space<vmem>>, %arg4: memref<128x2xbf16, #tpu.memory_space<vmem>>, %arg5: memref<1x2xf32, #tpu.memory_space<vmem>>, %arg6: memref<8x2xf32, #tpu.memory_space<vmem>>) attributes {dimension_semantics = [#tpu.dimension_semantics<parallel>], iteration_bounds = array<i64: 1>, scalar_prefetch = 0 : i64, scratch_operands = 0 : i64, tpu.core_type = #tpu.core_type<tc>, window_params = [{transform_indices = @transform_0, window_bounds = array<i64: 8, 3099>}, {pipeline_mode = #tpu.pipeline_mode<synchronous>, transform_indices = @transform_1, window_bounds = array<i64: 3099, 128>}, {pipeline_mode = #tpu.pipeline_mode<synchronous>, transform_indices = @transform_2, window_bounds = array<i64: 1, 128>}, {pipeline_mode = #tpu.pipeline_mode<synchronous>, transform_indices = @transform_3, window_bounds = array<i64: 128, 2>}, {pipeline_mode = #tpu.pipeline_mode<synchronous>, transform_indices = @transform_4, window_bounds = array<i64: 1, 2>}, {transform_indices = @transform_5, window_bounds = array<i64: 8, 2>}]} {
    %c0 = arith.constant 0 : index
    %c0_0 = arith.constant 0 : index
    %0 = vector.load %arg1[%c0, %c0_0] : memref<8x3099xf32, #tpu.memory_space<vmem>>, vector<8x3099xf32>
    %1 = arith.truncf %0 : vector<8x3099xf32> to vector<8x3099xbf16>
    %c0_1 = arith.constant 0 : index
    %c0_2 = arith.constant 0 : index
    %2 = vector.load %arg2[%c0_1, %c0_2] : memref<3099x128xbf16, #tpu.memory_space<vmem>>, vector<3099x128xbf16>
    %cst = arith.constant dense<0.000000e+00> : vector<8x128xf32>
    %3 = tpu.matmul %1, %2, %cst {dimension_numbers = #tpu.dot_dimension_numbers<[1], [0], [0], [1], [0, 0, 1, 1], [], []>} : vector<8x3099xbf16>, vector<3099x128xbf16>, vector<8x128xf32> -> vector<8x128xf32>
    %c0_3 = arith.constant 0 : index
    %c0_4 = arith.constant 0 : index
    %4 = vector.load %arg3[%c0_3, %c0_4] : memref<1x128xf32, #tpu.memory_space<vmem>>, vector<1x128xf32>
    %5 = vector.broadcast %4 : vector<1x128xf32> to vector<8x128xf32>
    %6 = arith.addf %3, %5 : vector<8x128xf32>
    %cst_5 = arith.constant 0.000000e+00 : f32
    %7 = vector.broadcast %cst_5 : f32 to vector<8x128xf32>
    %8 = arith.maximumf %6, %7 : vector<8x128xf32>
    %9 = arith.truncf %8 : vector<8x128xf32> to vector<8x128xbf16>
    %c0_6 = arith.constant 0 : index
    %c0_7 = arith.constant 0 : index
    %10 = vector.load %arg4[%c0_6, %c0_7] : memref<128x2xbf16, #tpu.memory_space<vmem>>, vector<128x2xbf16>
    %cst_8 = arith.constant dense<0.000000e+00> : vector<8x2xf32>
    %11 = tpu.matmul %9, %10, %cst_8 {dimension_numbers = #tpu.dot_dimension_numbers<[1], [0], [0], [1], [0, 0, 1, 1], [], []>} : vector<8x128xbf16>, vector<128x2xbf16>, vector<8x2xf32> -> vector<8x2xf32>
    %c0_9 = arith.constant 0 : index
    %c0_10 = arith.constant 0 : index
    %12 = vector.load %arg5[%c0_9, %c0_10] : memref<1x2xf32, #tpu.memory_space<vmem>>, vector<1x2xf32>
    %13 = vector.broadcast %12 : vector<1x2xf32> to vector<8x2xf32>
    %14 = arith.addf %11, %13 : vector<8x2xf32>
    %c0_11 = arith.constant 0 : index
    %c0_12 = arith.constant 0 : index
    %15 = vector.load %arg6[%c0_11, %c0_12] : memref<8x2xf32, #tpu.memory_space<vmem>>, vector<8x2xf32>
    tpu.vector_store %arg6[%c0_11, %c0_12], %14 {strides = array<i32>} : memref<8x2xf32, #tpu.memory_space<vmem>>, vector<8x2xf32>,
    return
  }
  func.func @transform_0(%arg0: i32) -> (i32, i32) {
    %c0_i32 = arith.constant 0 : i32
    %c0_i32_0 = arith.constant 0 : i32
    return %arg0, %c0_i32 : i32, i32
  }
  func.func @transform_1(%arg0: i32) -> (i32, i32) {
    %c0_i32 = arith.constant 0 : i32
    %c0_i32_0 = arith.constant 0 : i32
    %c0_i32_1 = arith.constant 0 : i32
    return %c0_i32, %c0_i32_0 : i32, i32
  }
  func.func @transform_2(%arg0: i32) -> (i32, i32) {
    %c0_i32 = arith.constant 0 : i32
    %c0_i32_0 = arith.constant 0 : i32
    %c0_i32_1 = arith.constant 0 : i32
    return %c0_i32, %c0_i32_0 : i32, i32
  }
  func.func @transform_3(%arg0: i32) -> (i32, i32) {
    %c0_i32 = arith.constant 0 : i32
    %c0_i32_0 = arith.constant 0 : i32
    %c0_i32_1 = arith.constant 0 : i32
    return %c0_i32, %c0_i32_0 : i32, i32
  }
  func.func @transform_4(%arg0: i32) -> (i32, i32) {
    %c0_i32 = arith.constant 0 : i32
    %c0_i32_0 = arith.constant 0 : i32
    %c0_i32_1 = arith.constant 0 : i32
    return %c0_i32, %c0_i32_0 : i32, i32
  }
  func.func @transform_5(%arg0: i32) -> (i32, i32) {
    %c0_i32 = arith.constant 0 : i32
    %c0_i32_0 = arith.constant 0 : i32
    return %arg0, %c0_i32 : i32, i32
  }
}

</mosaic_0001>

<bundles_post_ra>
// kernel: tpu_custom_call.1
= control target key start
LH: loop header
LB: loop body
LE: loop exit
PB: predicated region body
PF: predicated region fallthrough
CT: control target
= control target key end

     0   :  { %10 = vsyncpa [#allocation3], 0  ;;  %s3227_s0 = inlined_call_operand.hbm [shape: f32[8,3099], index: 0, kind: input, shape index: {}]   ;;  %s3228_s1 = inlined_call_operand.hbm [shape: bf16[3099,128], index: 1, kind: input, shape index: {}]   ;;  %s3229_s2 = inlined_call_operand.vmem [shape: f32[1,128], index: 2, kind: input, shape index: {}]   ;;  %s3230_s3 = inlined_call_operand.vmem [shape: bf16[128,2], index: 3, kind: input, shape index: {}]   ;;  %s3231_s4 = inlined_call_operand.vmem [shape: f32[1,2], index: 4, kind: input, shape index: {}]   ;;  %s3232_s5 = inlined_call_operand.vmem [shape: f32[8,2], index: 5, kind: output, shape index: {}]  }
   0x1   :  { %s17_s20 = sshll.u32 %s3227_s0, 4  ;;  %s18_s20 = int_to_ptr.hbm [resolvable:$true] %s17_s20 }
   0x2   :  { %11 = vsyncpa [#allocation5], 0  ;;  %s3153_s21 = smov [#allocation2]   ;;  %s27_s25 = sshll.u32 %s3228_s1, 4  ;;  %s28_s25 = int_to_ptr.hbm [resolvable:$true] %s27_s25 }
   0x3   :  { %s19_s22 = sshll.u32 %s3153_s21, 4  ;;  %s3154_s26 = smov [#allocation4]   ;;  %s20_s22 = int_to_ptr.vmem [resolvable:$true] %s19_s22 }
   0x4   :  { %22 = dma.hbm_to_vmem [thread:$0]  %s18_s20, 3200, %s20_s22, [#allocation3]  }
   0x5   :  { %s29_s27 = sshll.u32 %s3154_s26, 4  ;;  %s3155_s28 = smov 64   ;;  %s30_s27 = int_to_ptr.vmem [resolvable:$true] %s29_s27 }
   0x6   :  { %s3156_s29 = smov 4  }
   0x7   :  { %35 = dma.hbm_to_vmem [thread:$0]  %s28_s25, 24832, %s30_s27, [#allocation5], %s3155_s28, %s3155_s28, %s3156_s29  }
   0x8   :  { %3149 = dma.done.wait [#allocation3], 3200  }
   0x9   :  { %3150 = vsyncadd [#allocation3], 4294964096 }
   0xa   :  { %3151 = dma.done.wait [#allocation5], 24832  }
   0xb   :  { %3152 = vsyncadd [#allocation5], 4294942464  ;;  %v2899_v0 = vld [vmem:[#allocation4 + $0x38] sm:$0xff]  ;;  %v2898_v4 = vld [vmem:[#allocation4 + $0x30] sm:$0xff]  ;;  %vm1660_vm0 = vcmask 1044480   ;;  %vm1661_vm1 = vcmask 1045504  }
   0xc   :  { %v2915_v1 = vld [vmem:[#allocation4 + $0xb8] sm:$0xff]  ;;  %1667 = vmatpush.bf16.msra.mxu0 %v2899_v0  ;;  %v2914_v5 = vld [vmem:[#allocation4 + $0xb0] sm:$0xff]  ;;  %v2897_v8 = vld [vmem:[#allocation4 + $0x28] sm:$0xff]  ;;  %vm1656_vm2 = vcmask 220160   ;;  %vm2075_vm3 = vcmask 15360  }
   0xd   :  { %v2923_v2 = vld [vmem:[#allocation4 + $0xf8] sm:$0xff]  ;;  %1693 = vmatpush.bf16.msra.mxu2 %v2915_v1  ;;  %v2922_v6 = vld [vmem:[#allocation4 + $0xf0] sm:$0xff]  ;;  %v2913_v9 = vld [vmem:[#allocation4 + $0xa8] sm:$0xff] }
   0xe   :  { %v2907_v3 = vld [vmem:[#allocation4 + $0x78] sm:$0xff]  ;;  %1706 = vmatpush.bf16.msra.mxu3 %v2923_v2  ;;  %v2906_v7 = vld [vmem:[#allocation4 + $0x70] sm:$0xff]  ;;  %v2921_v10 = vld [vmem:[#allocation4 + $0xe8] sm:$0xff] }
   0xf   :  { %1680 = vmatpush.bf16.msra.mxu1 %v2907_v3  ;;  %v2905_v11 = vld [vmem:[#allocation4 + $0x68] sm:$0xff]  ;;  %v2896_v12 = vld [vmem:[#allocation4 + $0x20] sm:$0xff]  ;;  %v2895_v16 = vld [vmem:[#allocation4 + $0x18] sm:$0xff] }
  0x10   :  { %1668 = vmatpush.bf16.msra.mxu0 %v2898_v4  ;;  %v2912_v13 = vld [vmem:[#allocation4 + $0xa0] sm:$0xff]  ;;  %v2911_v17 = vld [vmem:[#allocation4 + $0x98] sm:$0xff]  ;;  %v2894_v20 = vld [vmem:[#allocation4 + $0x10] sm:$0xff] }
  0x11   :  { %1694 = vmatpush.bf16.msra.mxu2 %v2914_v5  ;;  %v2920_v14 = vld [vmem:[#allocation4 + $0xe0] sm:$0xff]  ;;  %v2919_v18 = vld [vmem:[#allocation4 + $0xd8] sm:$0xff]  ;;  %v2910_v21 = vld [vmem:[#allocation4 + $0x90] sm:$0xff] }
  0x12   :  { %1707 = vmatpush.bf16.msra.mxu3 %v2922_v6  ;;  %v2904_v15 = vld [vmem:[#allocation4 + $0x60] sm:$0xff]  ;;  %v2903_v19 = vld [vmem:[#allocation4 + $0x58] sm:$0xff]  ;;  %v2918_v22 = vld [vmem:[#allocation4 + $0xd0] sm:$0xff] }
  0x13   :  { %1681 = vmatpush.bf16.msra.mxu1 %v2906_v7  ;;  %v2902_v23 = vld [vmem:[#allocation4 + $0x50] sm:$0xff]  ;;  %v2893_v24 = vld [vmem:[#allocation4 + $0x8] sm:$0xff]  ;;  %v2892_v28 = vld [vmem:[#allocation4] sm:$0xff] }
  0x14   :  { %1669 = vmatpush.bf16.msra.mxu0 %v2897_v8  ;;  %v2909_v25 = vld [vmem:[#allocation4 + $0x88] sm:$0xff]  ;;  %v2908_v29 = vld [vmem:[#allocation4 + $0x80] sm:$0xff]  ;;  %v2931_v32 = vld [vmem:[#allocation4 + $0x138] sm:$0xff] }
  0x15   :  { %1695 = vmatpush.bf16.msra.mxu2 %v2913_v9  ;;  %v2917_v26 = vld [vmem:[#allocation4 + $0xc8] sm:$0xff]  ;;  %v2916_v31 = vld [vmem:[#allocation4 + $0xc0] sm:$0xff]  ;;  %v51_v33 = vld [vmem:[#allocation2] sm:$0xff] }
  0x16   :  { %1708 = vmatpush.bf16.msra.mxu3 %v2921_v10  ;;  %v2901_v27 = vld [vmem:[#allocation4 + $0x48] sm:$0xff]  ;;  %v2947_v34 = vld [vmem:[#allocation4 + $0x1b8] sm:$0xff]  ;;  %v54_v36 = vld [vmem:[#allocation2 + $0x18] sm:$0xff]  ;;  %v76_v40 = vpack.c.bf16 %v51_v33, %v51_v33 }
  0x17   :  { %1682 = vmatpush.bf16.msra.mxu1 %v2905_v11  ;;  %v53_v30 = vld [vmem:[#allocation2 + $0x10] sm:$0xff]  ;;  %v2955_v35 = vld [vmem:[#allocation4 + $0x1f8] sm:$0xff]  ;;  %v2900_v37 = vld [vmem:[#allocation4 + $0x40] sm:$0xff]  ;;  %v79_v43 = vpack.c.bf16 %v54_v36, %v54_v36 }
  0x18   :  { %1670 = vmatpush.bf16.msra.mxu0 %v2896_v12  ;;  %v78_v38 = vpack.c.bf16 %v53_v30, %v53_v30  ;;  %v2939_v39 = vld [vmem:[#allocation4 + $0x178] sm:$0xff]  ;;  %v52_v41 = vld [vmem:[#allocation2 + $0x8] sm:$0xff]  ;;  %v2930_v42 = vld [vmem:[#allocation4 + $0x130] sm:$0xff] }
  0x19   :  { %1696 = vmatpush.bf16.msra.mxu2 %v2912_v13  ;;  %v2946_v44 = vld [vmem:[#allocation4 + $0x1b0] sm:$0xff]  ;;  %v77_v46 = vpack.c.bf16 %v52_v41, %v52_v41  ;;  %v2929_v48 = vld [vmem:[#allocation4 + $0x128] sm:$0xff]  ;;  %v2928_v52 = vld [vmem:[#allocation4 + $0x120] sm:$0xff] }
  0x1a   :  { %1709 = vmatpush.bf16.msra.mxu3 %v2920_v14  ;;  %v2954_v45 = vld [vmem:[#allocation4 + $0x1f0] sm:$0xff]  ;;  %v2945_v49 = vld [vmem:[#allocation4 + $0x1a8] sm:$0xff]  ;;  %v2944_v53 = vld [vmem:[#allocation4 + $0x1a0] sm:$0xff] }
  0x1b   :  { %1683 = vmatpush.bf16.msra.mxu1 %v2904_v15  ;;  %v2938_v47 = vld [vmem:[#allocation4 + $0x170] sm:$0xff]  ;;  %v2953_v50 = vld [vmem:[#allocation4 + $0x1e8] sm:$0xff]  ;;  %v2952_v54 = vld [vmem:[#allocation4 + $0x1e0] sm:$0xff] }
  0x1c   :  { %1671 = vmatpush.bf16.msra.mxu0 %v2895_v16  ;;  %v2937_v51 = vld [vmem:[#allocation4 + $0x168] sm:$0xff]  ;;  %v2936_v55 = vld [vmem:[#allocation4 + $0x160] sm:$0xff]  ;;  %v2927_v56 = vld [vmem:[#allocation4 + $0x118] sm:$0xff] }
  0x1d   :  { %1697 = vmatpush.bf16.msra.mxu2 %v2911_v17  ;;  %v2943_v57 = vld [vmem:[#allocation4 + $0x198] sm:$0xff]  ;;  %v2926_v60 = vld [vmem:[#allocation4 + $0x110] sm:$0xff]  ;;  %v2925_v0 = vld [vmem:[#allocation4 + $0x108] sm:$0xff] }
  0x1e   :  { %1710 = vmatpush.bf16.msra.mxu3 %v2919_v18  ;;  %v2951_v58 = vld [vmem:[#allocation4 + $0x1d8] sm:$0xff]  ;;  %v2942_v61 = vld [vmem:[#allocation4 + $0x190] sm:$0xff]  ;;  %v2941_v1 = vld [vmem:[#allocation4 + $0x188] sm:$0xff] }
  0x1f   :  { %1684 = vmatpush.bf16.msra.mxu1 %v2903_v19  ;;  %v2935_v59 = vld [vmem:[#allocation4 + $0x158] sm:$0xff]  ;;  %v2950_v62 = vld [vmem:[#allocation4 + $0x1d0] sm:$0xff]  ;;  %v2949_v2 = vld [vmem:[#allocation4 + $0x1c8] sm:$0xff] }
  0x20   :  { %1672 = vmatpush.bf16.msra.mxu0 %v2894_v20  ;;  %v2934_v63 = vld [vmem:[#allocation4 + $0x150] sm:$0xff]  ;;  %v2933_v3 = vld [vmem:[#allocation4 + $0x148] sm:$0xff]  ;;  %v2924_v4 = vld [vmem:[#allocation4 + $0x100] sm:$0xff] }
  0x21   :  { %1698 = vmatpush.bf16.msra.mxu2 %v2910_v21  ;;  %v2940_v5 = vld [vmem:[#allocation4 + $0x180] sm:$0xff]  ;;  %v2963_v7 = vld [vmem:[#allocation4 + $0x238] sm:$0xff]  ;;  %v57_v8 = vld [vmem:[#allocation2 + $0x30] sm:$0xff] }
  0x22   :  { %1711 = vmatpush.bf16.msra.mxu3 %v2918_v22  ;;  %v2948_v6 = vld [vmem:[#allocation4 + $0x1c0] sm:$0xff]  ;;  %v2979_v9 = vld [vmem:[#allocation4 + $0x2b8] sm:$0xff]  ;;  %v58_v11 = vld [vmem:[#allocation2 + $0x38] sm:$0xff]  ;;  %v82_v15 = vpack.c.bf16 %v57_v8, %v57_v8 }
  0x23   :  { %1685 = vmatpush.bf16.msra.mxu1 %v2902_v23  ;;  %v55_v10 = vld [vmem:[#allocation2 + $0x20] sm:$0xff]  ;;  %v2932_v13 = vld [vmem:[#allocation4 + $0x140] sm:$0xff]  ;;  %v83_v18 = vpack.c.bf16 %v58_v11, %v58_v11  ;;  %v2962_v19 = vld [vmem:[#allocation4 + $0x230] sm:$0xff] }
  0x24   :  { %1673 = vmatpush.bf16.msra.mxu0 %v2893_v24  ;;  %v2987_v12 = vld [vmem:[#allocation4 + $0x2f8] sm:$0xff]  ;;  %v56_v16 = vld [vmem:[#allocation2 + $0x28] sm:$0xff]  ;;  %v80_v17 = vpack.c.bf16 %v55_v10, %v55_v10  ;;  %v2978_v20 = vld [vmem:[#allocation4 + $0x2b0] sm:$0xff] }
  0x25   :  { %1699 = vmatpush.bf16.msra.mxu2 %v2909_v25  ;;  %v2971_v14 = vld [vmem:[#allocation4 + $0x278] sm:$0xff]  ;;  %v2986_v21 = vld [vmem:[#allocation4 + $0x2f0] sm:$0xff]  ;;  %v81_v22 = vpack.c.bf16 %v56_v16, %v56_v16  ;;  %v2961_v24 = vld [vmem:[#allocation4 + $0x228] sm:$0xff] }
  0x26   :  { %1712 = vmatpush.bf16.msra.mxu3 %v2917_v26  ;;  %v2970_v23 = vld [vmem:[#allocation4 + $0x270] sm:$0xff]  ;;  %v2977_v25 = vld [vmem:[#allocation4 + $0x2a8] sm:$0xff]  ;;  %v2984_v30 = vld [vmem:[#allocation4 + $0x2e0] sm:$0xff] }
  0x27   :  { %1686 = vmatpush.bf16.msra.mxu1 %v2901_v27  ;;  %v2985_v26 = vld [vmem:[#allocation4 + $0x2e8] sm:$0xff]  ;;  %v2975_v33 = vld [vmem:[#allocation4 + $0x298] sm:$0xff]  ;;  %v2958_v36 = vld [vmem:[#allocation4 + $0x210] sm:$0xff] }
  0x28   :  { %1674 = vmatpush.bf16.msra.mxu0 %v2892_v28  ;;  %v2969_v27 = vld [vmem:[#allocation4 + $0x268] sm:$0xff]  ;;  %v2960_v28 = vld [vmem:[#allocation4 + $0x220] sm:$0xff]  ;;  %v2991_v8 = vld [vmem:[#allocation4 + $0x318] sm:$0xff] }
  0x29   :  { %1700 = vmatpush.bf16.msra.mxu2 %v2908_v29  ;;  %v2976_v29 = vld [vmem:[#allocation4 + $0x2a0] sm:$0xff]  ;;  %v2973_v41 = vld [vmem:[#allocation4 + $0x288] sm:$0xff]  ;;  %v3015_v10 = vld [vmem:[#allocation4 + $0x3d8] sm:$0xff] }
  0x2a   :  { %1713 = vmatpush.bf16.msra.mxu3 %v2916_v31  ;;  %v2968_v31 = vld [vmem:[#allocation4 + $0x260] sm:$0xff]  ;;  %v2999_v11 = vld [vmem:[#allocation4 + $0x358] sm:$0xff]  ;;  %v2989_v16 = vld [vmem:[#allocation4 + $0x308] sm:$0xff] }
  0x2b   :  { %1687 = vmatpush.bf16.msra.mxu1 %v2900_v37  ;;  %1675 = vmatmul.bf16.vlgmr.msra.gmra.mxu0 %v76_v40  ;;  %v2974_v37 = vld [vmem:[#allocation4 + $0x290] sm:$0xff]  ;;  %v2957_v40 = vld [vmem:[#allocation4 + $0x208] sm:$0xff] }
  0x2c   :  { %1719 = vmatpush.bf16.msrb.mxu0 %v2931_v32  ;;  %1701 = vmatmul.bf16.vlgmr.msra.gmra.mxu2 %v78_v38  ;;  %v2959_v32 = vld [vmem:[#allocation4 + $0x218] sm:$0xff]  ;;  %v2982_v38 = vld [vmem:[#allocation4 + $0x2d0] sm:$0xff] }
  0x2d   :  { %1745 = vmatpush.bf16.msrb.mxu2 %v2947_v34  ;;  %1714 = vmatmul.bf16.vlgmr.msra.gmra.mxu3 %v79_v43  ;;  %v2983_v34 = vld [vmem:[#allocation4 + $0x2d8] sm:$0xff]  ;;  %v2965_v43 = vld [vmem:[#allocation4 + $0x248] sm:$0xff] }
  0x2e   :  { %1758 = vmatpush.bf16.msrb.mxu3 %v2955_v35  ;;  %1688 = vmatmul.bf16.vlgmr.msra.gmra.mxu1 %v77_v46  ;;  %v2967_v35 = vld [vmem:[#allocation4 + $0x258] sm:$0xff] }
  0x2f   :  { %1732 = vmatpush.bf16.msrb.mxu1 %v2939_v39  ;;  %v2966_v39 = vld [vmem:[#allocation4 + $0x250] sm:$0xff]  ;;  %v59_v46 = vld [vmem:[#allocation2 + $0x40] sm:$0xff] }
  0x30   :  { %1720 = vmatpush.bf16.msrb.mxu0 %v2930_v42  ;;  %v2981_v42 = vld [vmem:[#allocation4 + $0x2c8] sm:$0xff] }
  0x31   :  { %1746 = vmatpush.bf16.msrb.mxu2 %v2946_v44  ;;  %v2956_v44 = vld [vmem:[#allocation4 + $0x200] sm:$0xff] }
  0x32   :  { %1759 = vmatpush.bf16.msrb.mxu3 %v2954_v45  ;;  %v2972_v45 = vld [vmem:[#allocation4 + $0x280] sm:$0xff] }
  0x33   :  { %1733 = vmatpush.bf16.msrb.mxu1 %v2938_v47  ;;  %v2980_v47 = vld [vmem:[#allocation4 + $0x2c0] sm:$0xff] }
  0x34   :  { %1721 = vmatpush.bf16.msrb.mxu0 %v2929_v48  ;;  %v2995_v48 = vld [vmem:[#allocation4 + $0x338] sm:$0xff] }
  0x35   :  { %1747 = vmatpush.bf16.msrb.mxu2 %v2945_v49  ;;  %v61_v49 = vld [vmem:[#allocation2 + $0x50] sm:$0xff] }
  0x36   :  { %1760 = vmatpush.bf16.msrb.mxu3 %v2953_v50  ;;  %v3011_v50 = vld [vmem:[#allocation4 + $0x3b8] sm:$0xff] }
  0x37   :  { %1734 = vmatpush.bf16.msrb.mxu1 %v2937_v51  ;;  %v3019_v51 = vld [vmem:[#allocation4 + $0x3f8] sm:$0xff] }
  0x38   :  { %1722 = vmatpush.bf16.msrb.mxu0 %v2928_v52  ;;  %v62_v52 = vld [vmem:[#allocation2 + $0x58] sm:$0xff] }
  0x39   :  { %1748 = vmatpush.bf16.msrb.mxu2 %v2944_v53  ;;  %v2964_v53 = vld [vmem:[#allocation4 + $0x240] sm:$0xff] }
  0x3a   :  { %1761 = vmatpush.bf16.msrb.mxu3 %v2952_v54  ;;  %v84_v54 = vpack.c.bf16 %v59_v46, %v59_v46  ;;  %v3048_v46 = vld [vmem:[#allocation4 + $0x4e0] sm:$0xff] }
  0x3b   :  { %1735 = vmatpush.bf16.msrb.mxu1 %v2936_v55  ;;  %v60_v55 = vld [vmem:[#allocation2 + $0x48] sm:$0xff] }
  0x3c   :  { %1723 = vmatpush.bf16.msrb.mxu0 %v2927_v56  ;;  %v86_v56 = vpack.c.bf16 %v61_v49, %v61_v49  ;;  %v3039_v49 = vld [vmem:[#allocation4 + $0x498] sm:$0xff] }
  0x3d   :  { %1749 = vmatpush.bf16.msrb.mxu2 %v2943_v57  ;;  %v3003_v57 = vld [vmem:[#allocation4 + $0x378] sm:$0xff] }
  0x3e   :  { %1762 = vmatpush.bf16.msrb.mxu3 %v2951_v58  ;;  %v87_v58 = vpack.c.bf16 %v62_v52, %v62_v52  ;;  %v3022_v52 = vld [vmem:[#allocation4 + $0x410] sm:$0xff] }
  0x3f   :  { %1736 = vmatpush.bf16.msrb.mxu1 %v2935_v59  ;;  %v2994_v59 = vld [vmem:[#allocation4 + $0x330] sm:$0xff] }
  0x40   :  { %1724 = vmatpush.bf16.msrb.mxu0 %v2926_v60  ;;  %v85_v60 = vpack.c.bf16 %v60_v55, %v60_v55  ;;  %v3030_v55 = vld [vmem:[#allocation4 + $0x450] sm:$0xff] }
  0x41   :  { %1750 = vmatpush.bf16.msrb.mxu2 %v2942_v61  ;;  %v3010_v61 = vld [vmem:[#allocation4 + $0x3b0] sm:$0xff] }
  0x42   :  { %1763 = vmatpush.bf16.msrb.mxu3 %v2950_v62  ;;  %v3018_v62 = vld [vmem:[#allocation4 + $0x3f0] sm:$0xff] }
  0x43   :  { %1737 = vmatpush.bf16.msrb.mxu1 %v2934_v63  ;;  %v3002_v63 = vld [vmem:[#allocation4 + $0x370] sm:$0xff] }
  0x44   :  { %1725 = vmatpush.bf16.msrb.mxu0 %v2925_v0  ;;  %v2993_v0 = vld [vmem:[#allocation4 + $0x328] sm:$0xff] }
  0x45   :  { %1751 = vmatpush.bf16.msrb.mxu2 %v2941_v1  ;;  %v3009_v1 = vld [vmem:[#allocation4 + $0x3a8] sm:$0xff] }
  0x46   :  { %1764 = vmatpush.bf16.msrb.mxu3 %v2949_v2  ;;  %v3017_v2 = vld [vmem:[#allocation4 + $0x3e8] sm:$0xff] }
  0x47   :  { %1738 = vmatpush.bf16.msrb.mxu1 %v2933_v3  ;;  %v3001_v3 = vld [vmem:[#allocation4 + $0x368] sm:$0xff] }
  0x48   :  { %1726 = vmatpush.bf16.msrb.mxu0 %v2924_v4  ;;  %v2992_v4 = vld [vmem:[#allocation4 + $0x320] sm:$0xff] }
  0x49   :  { %1752 = vmatpush.bf16.msrb.mxu2 %v2940_v5  ;;  %v3008_v5 = vld [vmem:[#allocation4 + $0x3a0] sm:$0xff] }
  0x4a   :  { %1765 = vmatpush.bf16.msrb.mxu3 %v2948_v6  ;;  %v3016_v6 = vld [vmem:[#allocation4 + $0x3e0] sm:$0xff] }
  0x4b   :  { %1739 = vmatpush.bf16.msrb.mxu1 %v2932_v13  ;;  %1727 = vmatmul.bf16.vlgmr.msrb.gmra.mxu0 %v80_v17  ;;  %v3006_v13 = vld [vmem:[#allocation4 + $0x390] sm:$0xff]  ;;  %v3005_v17 = vld [vmem:[#allocation4 + $0x388] sm:$0xff] }
  0x4c   :  { %1771 = vmatpush.bf16.msra.mxu0 %v2963_v7  ;;  %1753 = vmatmul.bf16.vlgmr.msrb.gmra.mxu2 %v82_v15  ;;  %v3000_v7 = vld [vmem:[#allocation4 + $0x360] sm:$0xff]  ;;  %v2998_v15 = vld [vmem:[#allocation4 + $0x350] sm:$0xff] }
  0x4d   :  { %1797 = vmatpush.bf16.msra.mxu2 %v2979_v9  ;;  %1766 = vmatmul.bf16.vlgmr.msrb.gmra.mxu3 %v83_v18  ;;  %v3007_v9 = vld [vmem:[#allocation4 + $0x398] sm:$0xff]  ;;  %v3013_v18 = vld [vmem:[#allocation4 + $0x3c8] sm:$0xff] }
  0x4e   :  { %1810 = vmatpush.bf16.msra.mxu3 %v2987_v12  ;;  %1740 = vmatmul.bf16.vlgmr.msrb.gmra.mxu1 %v81_v22  ;;  %v2990_v12 = vld [vmem:[#allocation4 + $0x310] sm:$0xff]  ;;  %v3027_v22 = vld [vmem:[#allocation4 + $0x438] sm:$0xff] }
  0x4f   :  { %1784 = vmatpush.bf16.msra.mxu1 %v2971_v14  ;;  %v3014_v14 = vld [vmem:[#allocation4 + $0x3d0] sm:$0xff] }
  0x50   :  { %1772 = vmatpush.bf16.msra.mxu0 %v2962_v19  ;;  %v2997_v19 = vld [vmem:[#allocation4 + $0x348] sm:$0xff] }
  0x51   :  { %1798 = vmatpush.bf16.msra.mxu2 %v2978_v20  ;;  %v2988_v20 = vld [vmem:[#allocation4 + $0x300] sm:$0xff] }
  0x52   :  { %1811 = vmatpush.bf16.msra.mxu3 %v2986_v21  ;;  %v3004_v21 = vld [vmem:[#allocation4 + $0x380] sm:$0xff] }
  0x53   :  { %1785 = vmatpush.bf16.msra.mxu1 %v2970_v23  ;;  %v63_v23 = vld [vmem:[#allocation2 + $0x60] sm:$0xff] }
  0x54   :  { %1773 = vmatpush.bf16.msra.mxu0 %v2961_v24  ;;  %v65_v24 = vld [vmem:[#allocation2 + $0x70] sm:$0xff] }
  0x55   :  { %1799 = vmatpush.bf16.msra.mxu2 %v2977_v25  ;;  %v3012_v25 = vld [vmem:[#allocation4 + $0x3c0] sm:$0xff] }
  0x56   :  { %1812 = vmatpush.bf16.msra.mxu3 %v2985_v26  ;;  %v3043_v26 = vld [vmem:[#allocation4 + $0x4b8] sm:$0xff] }
  0x57   :  { %1786 = vmatpush.bf16.msra.mxu1 %v2969_v27  ;;  %v66_v27 = vld [vmem:[#allocation2 + $0x78] sm:$0xff] }
  0x58   :  { %1774 = vmatpush.bf16.msra.mxu0 %v2960_v28  ;;  %v3051_v28 = vld [vmem:[#allocation4 + $0x4f8] sm:$0xff] }
  0x59   :  { %1800 = vmatpush.bf16.msra.mxu2 %v2976_v29  ;;  %v2996_v29 = vld [vmem:[#allocation4 + $0x340] sm:$0xff] }
  0x5a   :  { %1813 = vmatpush.bf16.msra.mxu3 %v2984_v30  ;;  %v64_v30 = vld [vmem:[#allocation2 + $0x68] sm:$0xff] }
  0x5b   :  { %1787 = vmatpush.bf16.msra.mxu1 %v2968_v31  ;;  %v88_v31 = vpack.c.bf16 %v63_v23, %v63_v23  ;;  %v3080_v23 = vld [vmem:[#allocation4 + $0x5e0] sm:$0xff] }
  0x5c   :  { %1775 = vmatpush.bf16.msra.mxu0 %v2959_v32  ;;  %v90_v32 = vpack.c.bf16 %v65_v24, %v65_v24 }
  0x5d   :  { %1801 = vmatpush.bf16.msra.mxu2 %v2975_v33  ;;  %v3035_v33 = vld [vmem:[#allocation4 + $0x478] sm:$0xff] }
  0x5e   :  { %1814 = vmatpush.bf16.msra.mxu3 %v2983_v34  ;;  %v91_v34 = vpack.c.bf16 %v66_v27, %v66_v27  ;;  %v3055_v27 = vld [vmem:[#allocation4 + $0x518] sm:$0xff] }
  0x5f   :  { %1788 = vmatpush.bf16.msra.mxu1 %v2967_v35  ;;  %v89_v35 = vpack.c.bf16 %v64_v30, %v64_v30  ;;  %v3079_v30 = vld [vmem:[#allocation4 + $0x5d8] sm:$0xff] }
  0x60   :  { %1776 = vmatpush.bf16.msra.mxu0 %v2958_v36  ;;  %v3026_v36 = vld [vmem:[#allocation4 + $0x430] sm:$0xff] }
  0x61   :  { %1802 = vmatpush.bf16.msra.mxu2 %v2974_v37  ;;  %v3042_v37 = vld [vmem:[#allocation4 + $0x4b0] sm:$0xff] }
  0x62   :  { %1815 = vmatpush.bf16.msra.mxu3 %v2982_v38  ;;  %v3050_v38 = vld [vmem:[#allocation4 + $0x4f0] sm:$0xff] }
  0x63   :  { %1789 = vmatpush.bf16.msra.mxu1 %v2966_v39  ;;  %v3034_v39 = vld [vmem:[#allocation4 + $0x470] sm:$0xff] }
  0x64   :  { %1777 = vmatpush.bf16.msra.mxu0 %v2957_v40  ;;  %v3025_v40 = vld [vmem:[#allocation4 + $0x428] sm:$0xff] }
  0x65   :  { %1803 = vmatpush.bf16.msra.mxu2 %v2973_v41  ;;  %v3041_v41 = vld [vmem:[#allocation4 + $0x4a8] sm:$0xff] }
  0x66   :  { %1816 = vmatpush.bf16.msra.mxu3 %v2981_v42  ;;  %v3049_v42 = vld [vmem:[#allocation4 + $0x4e8] sm:$0xff] }
  0x67   :  { %1790 = vmatpush.bf16.msra.mxu1 %v2965_v43  ;;  %v3033_v43 = vld [vmem:[#allocation4 + $0x468] sm:$0xff] }
  0x68   :  { %1778 = vmatpush.bf16.msra.mxu0 %v2956_v44  ;;  %v3024_v44 = vld [vmem:[#allocation4 + $0x420] sm:$0xff] }
  0x69   :  { %1804 = vmatpush.bf16.msra.mxu2 %v2972_v45  ;;  %v3040_v45 = vld [vmem:[#allocation4 + $0x4a0] sm:$0xff] }
  0x6a   :  { %1817 = vmatpush.bf16.msra.mxu3 %v2980_v47  ;;  %v3032_v47 = vld [vmem:[#allocation4 + $0x460] sm:$0xff] }
  0x6b   :  { %1791 = vmatpush.bf16.msra.mxu1 %v2964_v53  ;;  %1779 = vmatmul.bf16.vlgmr.msra.gmra.mxu0 %v84_v54  ;;  %v3038_v53 = vld [vmem:[#allocation4 + $0x490] sm:$0xff] }
  0x6c   :  { %1823 = vmatpush.bf16.msrb.mxu0 %v2995_v48  ;;  %1805 = vmatmul.bf16.vlgmr.msra.gmra.mxu2 %v86_v56  ;;  %v3023_v48 = vld [vmem:[#allocation4 + $0x418] sm:$0xff]  ;;  %v3046_v54 = vld [vmem:[#allocation4 + $0x4d0] sm:$0xff]  ;;  %v3021_v56 = vld [vmem:[#allocation4 + $0x408] sm:$0xff] }
  0x6d   :  { %1849 = vmatpush.bf16.msrb.mxu2 %v3011_v50  ;;  %1818 = vmatmul.bf16.vlgmr.msra.gmra.mxu3 %v87_v58  ;;  %v3047_v50 = vld [vmem:[#allocation4 + $0x4d8] sm:$0xff]  ;;  %v3045_v58 = vld [vmem:[#allocation4 + $0x4c8] sm:$0xff] }
  0x6e   :  { %1862 = vmatpush.bf16.msrb.mxu3 %v3019_v51  ;;  %1792 = vmatmul.bf16.vlgmr.msra.gmra.mxu1 %v85_v60  ;;  %v3031_v51 = vld [vmem:[#allocation4 + $0x458] sm:$0xff]  ;;  %v3020_v60 = vld [vmem:[#allocation4 + $0x400] sm:$0xff] }
  0x6f   :  { %1836 = vmatpush.bf16.msrb.mxu1 %v3003_v57  ;;  %v3037_v57 = vld [vmem:[#allocation4 + $0x488] sm:$0xff] }
  0x70   :  { %1824 = vmatpush.bf16.msrb.mxu0 %v2994_v59  ;;  %v3029_v59 = vld [vmem:[#allocation4 + $0x448] sm:$0xff] }
  0x71   :  { %1850 = vmatpush.bf16.msrb.mxu2 %v3010_v61  ;;  %v3036_v61 = vld [vmem:[#allocation4 + $0x480] sm:$0xff] }
  0x72   :  { %1863 = vmatpush.bf16.msrb.mxu3 %v3018_v62  ;;  %v3044_v62 = vld [vmem:[#allocation4 + $0x4c0] sm:$0xff] }
  0x73   :  { %1837 = vmatpush.bf16.msrb.mxu1 %v3002_v63  ;;  %v67_v63 = vld [vmem:[#allocation2 + $0x80] sm:$0xff] }
  0x74   :  { %1825 = vmatpush.bf16.msrb.mxu0 %v2993_v0  ;;  %v69_v0 = vld [vmem:[#allocation2 + $0x90] sm:$0xff] }
  0x75   :  { %1851 = vmatpush.bf16.msrb.mxu2 %v3009_v1  ;;  %v3059_v1 = vld [vmem:[#allocation4 + $0x538] sm:$0xff] }
  0x76   :  { %1864 = vmatpush.bf16.msrb.mxu3 %v3017_v2  ;;  %v3075_v2 = vld [vmem:[#allocation4 + $0x5b8] sm:$0xff] }
  0x77   :  { %1838 = vmatpush.bf16.msrb.mxu1 %v3001_v3  ;;  %v70_v3 = vld [vmem:[#allocation2 + $0x98] sm:$0xff] }
  0x78   :  { %1826 = vmatpush.bf16.msrb.mxu0 %v2992_v4  ;;  %v3083_v4 = vld [vmem:[#allocation4 + $0x5f8] sm:$0xff] }
  0x79   :  { %1852 = vmatpush.bf16.msrb.mxu2 %v3008_v5  ;;  %v3028_v5 = vld [vmem:[#allocation4 + $0x440] sm:$0xff] }
  0x7a   :  { %1865 = vmatpush.bf16.msrb.mxu3 %v3016_v6  ;;  %v68_v6 = vld [vmem:[#allocation2 + $0x88] sm:$0xff] }
  0x7b   :  { %1839 = vmatpush.bf16.msrb.mxu1 %v3000_v7  ;;  %v92_v7 = vpack.c.bf16 %v67_v63, %v67_v63 }
  0x7c   :  { %1827 = vmatpush.bf16.msrb.mxu0 %v2991_v8  ;;  %v94_v8 = vpack.c.bf16 %v69_v0, %v69_v0  ;;  %v72_v0 = vld [vmem:[#allocation2 + $0xa8] sm:$0xff] }
  0x7d   :  { %1853 = vmatpush.bf16.msrb.mxu2 %v3007_v9  ;;  %v3067_v9 = vld [vmem:[#allocation4 + $0x578] sm:$0xff] }
  0x7e   :  { %1866 = vmatpush.bf16.msrb.mxu3 %v3015_v10  ;;  %v95_v10 = vpack.c.bf16 %v70_v3, %v70_v3  ;;  %v97_v3 = vpack.c.bf16 %v72_v0, %v72_v0 }
  0x7f   :  { %1840 = vmatpush.bf16.msrb.mxu1 %v2999_v11  ;;  %v93_v11 = vpack.c.bf16 %v68_v6, %v68_v6 }
  0x80   :  { %1828 = vmatpush.bf16.msrb.mxu0 %v2990_v12  ;;  %v3058_v12 = vld [vmem:[#allocation4 + $0x530] sm:$0xff] }
  0x81   :  { %1854 = vmatpush.bf16.msrb.mxu2 %v3006_v13  ;;  %v3074_v13 = vld [vmem:[#allocation4 + $0x5b0] sm:$0xff] }
  0x82   :  { %1867 = vmatpush.bf16.msrb.mxu3 %v3014_v14  ;;  %v3082_v14 = vld [vmem:[#allocation4 + $0x5f0] sm:$0xff] }
  0x83   :  { %1841 = vmatpush.bf16.msrb.mxu1 %v2998_v15  ;;  %v3066_v15 = vld [vmem:[#allocation4 + $0x570] sm:$0xff] }
  0x84   :  { %1829 = vmatpush.bf16.msrb.mxu0 %v2989_v16  ;;  %v3057_v16 = vld [vmem:[#allocation4 + $0x528] sm:$0xff] }
  0x85   :  { %1855 = vmatpush.bf16.msrb.mxu2 %v3005_v17  ;;  %v3073_v17 = vld [vmem:[#allocation4 + $0x5a8] sm:$0xff] }
  0x86   :  { %1868 = vmatpush.bf16.msrb.mxu3 %v3013_v18  ;;  %v3081_v18 = vld [vmem:[#allocation4 + $0x5e8] sm:$0xff] }
  0x87   :  { %1842 = vmatpush.bf16.msrb.mxu1 %v2997_v19  ;;  %v3099_v19 = vld [vmem:[%s3229_s2] ss:$0 sm:$0xff] }
  0x88   :  { %1830 = vmatpush.bf16.msrb.mxu0 %v2988_v20  ;;  %v3065_v20 = vld [vmem:[#allocation4 + $0x568] sm:$0xff] }
  0x89   :  { %1856 = vmatpush.bf16.msrb.mxu2 %v3004_v21  ;;  %v3056_v21 = vld [vmem:[#allocation4 + $0x520] sm:$0xff] }
  0x8a   :  { %1869 = vmatpush.bf16.msrb.mxu3 %v3012_v25 }
  0x8b   :  { %1843 = vmatpush.bf16.msrb.mxu1 %v2996_v29  ;;  %1831 = vmatmul.bf16.vlgmr.msrb.gmra.mxu0 %v88_v31  ;;  %v3071_v29 = vld [vmem:[#allocation4 + $0x598] sm:$0xff] }
  0x8c   :  { %1875 = vmatpush.bf16.msra.mxu0 %v3027_v22  ;;  %1857 = vmatmul.bf16.vlgmr.msrb.gmra.mxu2 %v90_v32  ;;  %v3072_v22 = vld [vmem:[#allocation4 + $0x5a0] sm:$0xff] }
  0x8d   :  { %1901 = vmatpush.bf16.msra.mxu2 %v3043_v26  ;;  %1870 = vmatmul.bf16.vlgmr.msrb.gmra.mxu3 %v91_v34  ;;  %v3064_v26 = vld [vmem:[#allocation4 + $0x560] sm:$0xff] }
  0x8e   :  { %1914 = vmatpush.bf16.msra.mxu3 %v3051_v28  ;;  %1844 = vmatmul.bf16.vlgmr.msrb.gmra.mxu1 %v89_v35  ;;  %v3054_v35 = vld [vmem:[#allocation4 + $0x510] sm:$0xff] }
  0x8f   :  { %1888 = vmatpush.bf16.msra.mxu1 %v3035_v33  ;;  %v3063_v33 = vld [vmem:[#allocation4 + $0x558] sm:$0xff] }
  0x90   :  { %1876 = vmatpush.bf16.msra.mxu0 %v3026_v36 }
  0x91   :  { %1902 = vmatpush.bf16.msra.mxu2 %v3042_v37  ;;  %v3070_v37 = vld [vmem:[#allocation4 + $0x590] sm:$0xff] }
  0x92   :  { %1915 = vmatpush.bf16.msra.mxu3 %v3050_v38  ;;  %v3078_v38 = vld [vmem:[#allocation4 + $0x5d0] sm:$0xff] }
  0x93   :  { %1889 = vmatpush.bf16.msra.mxu1 %v3034_v39 }
  0x94   :  { %1877 = vmatpush.bf16.msra.mxu0 %v3025_v40 }
  0x95   :  { %1903 = vmatpush.bf16.msra.mxu2 %v3041_v41  ;;  %v3062_v41 = vld [vmem:[#allocation4 + $0x550] sm:$0xff] }
  0x96   :  { %1916 = vmatpush.bf16.msra.mxu3 %v3049_v42  ;;  %v2857_v42 = vld [vmem:[#allocation4 + $0x608] sm:$0xf] }
  0x97   :  { %1890 = vmatpush.bf16.msra.mxu1 %v3033_v43  ;;  %v3085_v43 = vld [vmem:[#allocation4 + $0x608] sm:$0x30] }
  0x98   :  { %1878 = vmatpush.bf16.msra.mxu0 %v3024_v44  ;;  %v3053_v44 = vld [vmem:[#allocation4 + $0x508] sm:$0xff] }
  0x99   :  { %1904 = vmatpush.bf16.msra.mxu2 %v3040_v45  ;;  %v3157_v45 = vmov 65535  }
  0x9a   :  { %1917 = vmatpush.bf16.msra.mxu3 %v3048_v46  ;;  %v1662_v46 = vsel %vm1660_vm0, 4294967295, %v3157_v45  ;;  %v3089_v45 = vld [vmem:[%s3230_s3 + $0x18] sm:$0xff] }
  0x9b   :  { %1891 = vmatpush.bf16.msra.mxu1 %v3032_v47 }
  0x9c   :  { %1879 = vmatpush.bf16.msra.mxu0 %v3023_v48  ;;  %v3069_v48 = vld [vmem:[#allocation4 + $0x588] sm:$0xff] }
  0x9d   :  { %1905 = vmatpush.bf16.msra.mxu2 %v3039_v49  ;;  %v3077_v49 = vld [vmem:[#allocation4 + $0x5c8] sm:$0xff] }
  0x9e   :  { %1918 = vmatpush.bf16.msra.mxu3 %v3047_v50  ;;  %v2858_v50 = vor.u32 %v3085_v43, %v2857_v42  ;;  %v3090_v43 = vld [vmem:[%s3230_s3 + $0x20] sm:$0xff] }
  0x9f   :  { %1892 = vmatpush.bf16.msra.mxu1 %v3031_v51 }
  0xa0   :  { %1880 = vmatpush.bf16.msra.mxu0 %v3022_v52  ;;  %v3061_v52 = vld [vmem:[#allocation4 + $0x548] sm:$0xff] }
  0xa1   :  { %1906 = vmatpush.bf16.msra.mxu2 %v3038_v53  ;;  %v1663_v53 = vsel %vm1661_vm1, %v1662_v46, 0 }
  0xa2   :  { %1919 = vmatpush.bf16.msra.mxu3 %v3046_v54  ;;  %v3052_v54 = vld [vmem:[#allocation4 + $0x500] sm:$0xff] }
  0xa3   :  { %1893 = vmatpush.bf16.msra.mxu1 %v3030_v55  ;;  %v3068_v55 = vld [vmem:[#allocation4 + $0x580] sm:$0xff] }
  0xa4   :  { %1881 = vmatpush.bf16.msra.mxu0 %v3021_v56  ;;  %v71_v56 = vld [vmem:[#allocation2 + $0xa0] sm:$0xff] }
  0xa5   :  { %1907 = vmatpush.bf16.msra.mxu2 %v3037_v57  ;;  %v96_v63 = vpack.c.bf16 %v71_v56, %v71_v56 }
  0xa6   :  { %1920 = vmatpush.bf16.msra.mxu3 %v3045_v58  ;;  %v3076_v58 = vld [vmem:[#allocation4 + $0x5c0] sm:$0xff] }
  0xa7   :  { %1894 = vmatpush.bf16.msra.mxu1 %v3029_v59  ;;  %v73_v59 = vld [vmem:[#allocation2 + $0xb0] sm:$0xff] }
  0xa8   :  { %1882 = vmatpush.bf16.msra.mxu0 %v3020_v60  ;;  %v1676_v24 = vpop.f32.mrf.mxu0  ;;  %v74_v60 = vld [vmem:[#allocation2 + $0xb8] sm:$0xff] }
  0xa9   :  { %1908 = vmatpush.bf16.msra.mxu2 %v3036_v61  ;;  %v1677_v25 = vadd.f32 %v3099_v19, %v1676_v24  ;;  %v1665_v61 = vand.u32 %v2858_v50, %v1663_v53 }
  0xaa   :  { %1921 = vmatpush.bf16.msra.mxu3 %v3044_v62  ;;  %v3060_v62 = vld [vmem:[#allocation4 + $0x540] sm:$0xff] }
  0xab   :  { %1895 = vmatpush.bf16.msra.mxu1 %v3028_v5  ;;  %1883 = vmatmul.bf16.vlgmr.msra.gmra.mxu0 %v92_v7  ;;  %v1689_v28 = vpop.f32.mrf.mxu1  ;;  %v75_v7 = vld [vmem:[#allocation2 + $0xc0] sm:$0xff] }
  0xac   :  { %1927 = vmatpush.bf16.msrb.mxu0 %v3059_v1  ;;  %1909 = vmatmul.bf16.vlgmr.msra.gmra.mxu2 %v94_v8  ;;  %v1690_v31 = vadd.f32 %v1689_v28, %v1677_v25  ;;  %v98_v1 = vpack.c.bf16 %v73_v59, %v73_v59 }
  0xad   :  { %1953 = vmatpush.bf16.msrb.mxu2 %v3075_v2  ;;  %1922 = vmatmul.bf16.vlgmr.msra.gmra.mxu3 %v95_v10  ;;  %v99_v2 = vpack.c.bf16 %v74_v60, %v74_v60  ;;  %v100_v10 = vpack.c.bf16 %v75_v7, %v75_v7 }
  0xae   :  { %1966 = vmatpush.bf16.msrb.mxu3 %v3083_v4  ;;  %1896 = vmatmul.bf16.vlgmr.msra.gmra.mxu1 %v93_v11  ;;  %v3084_v4 = vld [vmem:[#allocation4 + $0x600] sm:$0xff] }
  0xaf   :  { %1940 = vmatpush.bf16.msrb.mxu1 %v3067_v9  ;;  %v1702_v32 = vpop.f32.mrf.mxu2 }
  0xb0   :  { %1928 = vmatpush.bf16.msrb.mxu0 %v3058_v12  ;;  %v1703_v34 = vadd.f32 %v1702_v32, %v1690_v31  ;;  %v1715_v36 = vpop.f32.mrf.mxu3  ;;  %v1678_v40 = vpop.f32.mrf.mxu0 }
  0xb1   :  { %1954 = vmatpush.bf16.msrb.mxu2 %v3074_v13 }
  0xb2   :  { %1967 = vmatpush.bf16.msrb.mxu3 %v3082_v14  ;;  %v1716_v39 = vadd.f32 %v1715_v36, %v1703_v34 }
  0xb3   :  { %1941 = vmatpush.bf16.msrb.mxu1 %v3066_v15  ;;  %v1691_v47 = vpop.f32.mrf.mxu1 }
  0xb4   :  { %1929 = vmatpush.bf16.msrb.mxu0 %v3057_v16 }
  0xb5   :  { %1955 = vmatpush.bf16.msrb.mxu2 %v3073_v17 }
  0xb6   :  { %1968 = vmatpush.bf16.msrb.mxu3 %v3081_v18 }
  0xb7   :  { %1942 = vmatpush.bf16.msrb.mxu1 %v3065_v20  ;;  %v1704_v51 = vpop.f32.mrf.mxu2 }
  0xb8   :  { %1930 = vmatpush.bf16.msrb.mxu0 %v3056_v21  ;;  %v1717_v57 = vpop.f32.mrf.mxu3 }
  0xb9   :  { %1956 = vmatpush.bf16.msrb.mxu2 %v3072_v22  ;;  %v3086_v57 = vld [vmem:[%s3230_s3] sm:$0xff] }
  0xba   :  { %1969 = vmatpush.bf16.msrb.mxu3 %v3080_v23 }
  0xbb   :  { %1943 = vmatpush.bf16.msrb.mxu1 %v3064_v26 }
  0xbc   :  { %1931 = vmatpush.bf16.msrb.mxu0 %v3055_v27 }
  0xbd   :  { %1957 = vmatpush.bf16.msrb.mxu2 %v3071_v29 }
  0xbe   :  { %1970 = vmatpush.bf16.msrb.mxu3 %v3079_v30 }
  0xbf   :  { %1944 = vmatpush.bf16.msrb.mxu1 %v3063_v33 }
  0xc0   :  { %1932 = vmatpush.bf16.msrb.mxu0 %v3054_v35  ;;  %v3093_v35 = vld [vmem:[%s3230_s3 + $0x38] sm:$0xff] }
  0xc1   :  { %1958 = vmatpush.bf16.msrb.mxu2 %v3070_v37 }
  0xc2   :  { %1971 = vmatpush.bf16.msrb.mxu3 %v3078_v38  ;;  %v3092_v38 = vld [vmem:[%s3230_s3 + $0x30] sm:$0xff] }
  0xc3   :  { %1945 = vmatpush.bf16.msrb.mxu1 %v3062_v41  ;;  %v3091_v41 = vld [vmem:[%s3230_s3 + $0x28] sm:$0xff] }
  0xc4   :  { %1933 = vmatpush.bf16.msrb.mxu0 %v3053_v44 }
  0xc5   :  { %1959 = vmatpush.bf16.msrb.mxu2 %v3069_v48 }
  0xc6   :  { %1972 = vmatpush.bf16.msrb.mxu3 %v3077_v49  ;;  %v3088_v49 = vld [vmem:[%s3230_s3 + $0x10] sm:$0xff] }
  0xc7   :  { %1946 = vmatpush.bf16.msrb.mxu1 %v3061_v52  ;;  %v3087_v52 = vld [vmem:[%s3230_s3 + $0x8] sm:$0xff] }
  0xc8   :  { %1934 = vmatpush.bf16.msrb.mxu0 %v3052_v54  ;;  %v1728_v5 = vpop.f32.mrf.mxu0 }
  0xc9   :  { %1960 = vmatpush.bf16.msrb.mxu2 %v3068_v55  ;;  %v1729_v6 = vadd.f32 %v1728_v5, %v1716_v39 }
  0xca   :  { %1973 = vmatpush.bf16.msrb.mxu3 %v3076_v58 }
  0xcb   :  { %1947 = vmatpush.bf16.msrb.mxu1 %v3060_v62  ;;  %1935 = vmatmul.bf16.vlgmr.msrb.gmra.mxu0 %v96_v63  ;;  %v1741_v8 = vpop.f32.mrf.mxu1 }
  0xcc   :  { %1985 = vmatpush.bf16.msra.mxu0 %v1665_v61  ;;  %1961 = vmatmul.bf16.vlgmr.msrb.gmra.mxu2 %v98_v1  ;;  %v1742_v9 = vadd.f32 %v1741_v8, %v1729_v6 }
  0xcd   :  { %1974 = vmatmul.bf16.vlgmr.msrb.gmra.mxu3 %v99_v2 }
  0xce   :  { %1948 = vmatmul.bf16.vlgmr.msrb.gmra.mxu1 %v97_v3 }
  0xcf   :  { %v1754_v11 = vpop.f32.mrf.mxu2  ;;  %2062 = vmatpush.bf16.msra.mxu1 %v3093_v35 }
  0xd0   :  { %1986 = vmatpush.bf16.msra.mxu0 %v3084_v4  ;;  %v1755_v12 = vadd.f32 %v1754_v11, %v1742_v9  ;;  %v1767_v13 = vpop.f32.mrf.mxu3  ;;  %v1730_v15 = vpop.f32.mrf.mxu0 }
  0xd2   :  { %v1768_v14 = vadd.f32 %v1767_v13, %v1755_v12 }
  0xd3   :  { %v1743_v16 = vpop.f32.mrf.mxu1  ;;  %2063 = vmatpush.bf16.msra.mxu1 %v3092_v38 }
  0xd4   :  { %v3100_v16 = vld [vmem:[%s3231_s4] ss:$0 sm:$0xff] }
  0xd7   :  { %v1756_v17 = vpop.f32.mrf.mxu2  ;;  %2064 = vmatpush.bf16.msra.mxu1 %v3091_v41 }
  0xd8   :  { %v1769_v18 = vpop.f32.mrf.mxu3 }
  0xdb   :  { %2859 = vmatmul.msk.bf16.vlgmr.msra.gmra.mxu0 %vm1656_vm2, %v100_v10  ;;  %2065 = vmatpush.bf16.msra.mxu1 %v3090_v43 }
  0xdf   :  { %2066 = vmatpush.bf16.msra.mxu1 %v3089_v45 }
  0xe3   :  { %2067 = vmatpush.bf16.msra.mxu1 %v3088_v49 }
  0xe7   :  { %2068 = vmatpush.bf16.msra.mxu1 %v3087_v52 }
  0xe8   :  { %v1780_v19 = vpop.f32.mrf.mxu0 }
  0xe9   :  { %v1781_v20 = vadd.f32 %v1780_v19, %v1768_v14 }
  0xeb   :  { %v1793_v21 = vpop.f32.mrf.mxu1  ;;  %2069 = vmatpush.bf16.msra.mxu1 %v3086_v57 }
  0xec   :  { %v1794_v22 = vadd.f32 %v1793_v21, %v1781_v20 }
  0xef   :  { %v1806_v23 = vpop.f32.mrf.mxu2 }
  0xf0   :  { %v1807_v24 = vadd.f32 %v1806_v23, %v1794_v22  ;;  %v1819_v25 = vpop.f32.mrf.mxu3  ;;  %v1782_v26 = vpop.f32.mrf.mxu0 }
  0xf2   :  { %v1820_v27 = vadd.f32 %v1819_v25, %v1807_v24 }
  0xf3   :  { %v1795_v28 = vpop.f32.mrf.mxu1 }
  0xf7   :  { %v1808_v29 = vpop.f32.mrf.mxu2 }
  0xf8   :  { %v1821_v30 = vpop.f32.mrf.mxu3 }
 0x108   :  { %v1832_v31 = vpop.f32.mrf.mxu0 }
 0x109   :  { %v1833_v50 = vadd.f32 %v1832_v31, %v1820_v27 }
 0x10b   :  { %v1845_v32 = vpop.f32.mrf.mxu1 }
 0x10c   :  { %v1846_v53 = vadd.f32 %v1845_v32, %v1833_v50 }
 0x10f   :  { %v1858_v33 = vpop.f32.mrf.mxu2 }
 0x110   :  { %v1871_v34 = vpop.f32.mrf.mxu3  ;;  %v1834_v36 = vpop.f32.mrf.mxu0  ;;  %v1859_v56 = vadd.f32 %v1858_v33, %v1846_v53 }
 0x112   :  { %v1872_v58 = vadd.f32 %v1871_v34, %v1859_v56 }
 0x113   :  { %v1847_v37 = vpop.f32.mrf.mxu1 }
 0x117   :  { %v1860_v39 = vpop.f32.mrf.mxu2 }
 0x118   :  { %v1873_v40 = vpop.f32.mrf.mxu3 }
 0x128   :  { %v1884_v42 = vpop.f32.mrf.mxu0 }
 0x129   :  { %v1885_v59 = vadd.f32 %v1884_v42, %v1872_v58 }
 0x12b   :  { %v1897_v44 = vpop.f32.mrf.mxu1 }
 0x12c   :  { %v1898_v60 = vadd.f32 %v1897_v44, %v1885_v59 }
 0x12f   :  { %v1910_v46 = vpop.f32.mrf.mxu2 }
 0x130   :  { %v1923_v47 = vpop.f32.mrf.mxu3  ;;  %v1886_v48 = vpop.f32.mrf.mxu0  ;;  %v1911_v61 = vadd.f32 %v1910_v46, %v1898_v60 }
 0x132   :  { %v1924_v63 = vadd.f32 %v1923_v47, %v1911_v61 }
 0x133   :  { %v1899_v51 = vpop.f32.mrf.mxu1 }
 0x137   :  { %v1912_v54 = vpop.f32.mrf.mxu2 }
 0x138   :  { %v1925_v55 = vpop.f32.mrf.mxu3 }
 0x148   :  { %v1936_v62 = vpop.f32.mrf.mxu0 }
 0x149   :  { %v1937_v1 = vadd.f32 %v1936_v62, %v1924_v63 }
 0x14b   :  { %v1949_v0 = vpop.f32.mrf.mxu1 }
 0x14c   :  { %v1950_v5 = vadd.f32 %v1949_v0, %v1937_v1 }
 0x14f   :  { %v1962_v2 = vpop.f32.mrf.mxu2 }
 0x150   :  { %v1975_v3 = vpop.f32.mrf.mxu3  ;;  %v1938_v4 = vpop.f32.mrf.mxu0  ;;  %v1963_v6 = vadd.f32 %v1962_v2, %v1950_v5 }
 0x152   :  { %v1976_v8 = vadd.f32 %v1975_v3, %v1963_v6 }
 0x153   :  { %v1951_v7 = vpop.f32.mrf.mxu1 }
 0x157   :  { %v1964_v9 = vpop.f32.mrf.mxu2 }
 0x158   :  { %v1977_v10 = vpop.f32.mrf.mxu3  ;;  %v1988_v11 = vpop.f32.mrf.mxu0 }
 0x159   :  { %v1989_v12 = vadd.f32 %v1988_v11, %v1976_v8 }
 0x15b   :  { %v1992_v13 = vmax.f32 %v1989_v12, 0.0 }
 0x15d   :  { %v1993_v14 = vpack.c.bf16 %v1992_v13, %v1992_v13 }
 0x15f   :  { %2070 = vmatmul.bf16.vlgmr.msra.gmra.mxu1 %v1993_v14 }
 0x160   :  { %v1990_v15 = vpop.f32.mrf.mxu0 }
 0x1dc   :  { %v2071_v17 = vpop.f32.mrf.mxu1 }
 0x1dd   :  { %v2072_v18 = vadd.f32 %v3100_v16, %v2071_v17 }
 0x1df   :  { %2076 = vst.msk [vmem:[%s3232_s5] sm:$0xff] %vm2075_vm3, %v2072_v18 }
 0x1e4   :  { %v2073_v19 = vpop.f32.mrf.mxu1 }
 0x1e5   :  { %2081 = vsyncpa [#allocation3], 1 }
 0x1e6   :  { %2082 = vsyncpa [#allocation5], 1 }

</bundles_post_ra>
